<compile_context>
chip_gen: v5e
topology: v5e:2x2
jax: 0.10.0
libtpu: 0.0.40
codegen_flags: <defaults>
</compile_context>

<pallas_src>
import math

import jax
import jax.numpy as jnp
from jax import lax
from jax.experimental import pallas as pl
from jax.experimental.pallas import tpu as pltpu


def _round_up(x, m):
    return ((x + m - 1) // m) * m


def _make_mlp_v_kernel(num_hidden):
    """Builds the kernel for a fixed (static) number of hidden layers."""

    def kernel(*refs):
        obs_ref, goal_ref = refs[0], refs[1]
        o_ref = refs[-1]
        p = refs[2:-1]
        w1o_ref, w1g_ref, b1_ref = p[0], p[1], p[2]
        wdt = w1o_ref.dtype

        # Layer 1: fused "concat" matmul  (obs | goal) @ W1 + b1, then ReLU.
        h = jnp.dot(obs_ref[...].astype(wdt), w1o_ref[...],
                    preferred_element_type=jnp.float32)
        h = h + jnp.dot(goal_ref[...].astype(wdt), w1g_ref[...],
                        preferred_element_type=jnp.float32)
        h = jnp.maximum(h + b1_ref[...].astype(jnp.float32), 0.0)

        # Remaining hidden layers (statically unrolled): Linear + ReLU.
        idx = 3
        for _ in range(num_hidden - 1):
            w_ref, b_ref = p[idx], p[idx + 1]
            idx += 2
            h = jnp.dot(h.astype(w_ref.dtype), w_ref[...],
                        preferred_element_type=jnp.float32)
            h = jnp.maximum(h + b_ref[...].astype(jnp.float32), 0.0)

        # Output layer, lane-dense: (1, H_last) . (tile_b, H_last)^T -> (1, tile_b).
        w_last, b_last = p[idx], p[idx + 1]
        v = lax.dot_general(w_last[...], h.astype(w_last.dtype),
                            dimension_numbers=(((1,), (1,)), ((), ())),
                            preferred_element_type=jnp.float32)
        o_ref[...] = (v + b_last[...].astype(jnp.float32)).astype(o_ref.dtype)

    return kernel


def mlp_v_function(obs, goal, params, *, tile_b=4096):
    """Pallas implementation of MLPVFunction.forward.

    obs:  (B, obs_dim); goal: (B, goal_dim); returns (B,) float32.
    params = (w1_obs, w1_goal, b1, w2, b2, ..., w_last_row, b_last) with weights
    stored (in_features, out_features) (transpose of torch nn.Linear.weight),
    W1 pre-split at the obs/goal boundary and the last weight as a (1, H) row.
    """
    assert len(params) >= 5 and (len(params) - 3) % 2 == 0
    num_hidden = (len(params) - 3) // 2

    B, obs_dim = obs.shape
    goal_dim = goal.shape[1]

    # --- tile selection -------------------------------------------------------
    # Single exact tile for small batches (no padded rows, block == full dims);
    # otherwise a large multiple-of-256 tile (full MXU width, lane-dense output
    # stores), capped at ceil(B/2) so the "parallel" grid has >= 2 steps and
    # both v7x TensorCores get work.
    if tile_b >= B:
        tile_b = B
        num_tiles = 1
    else:
        tile_b = min(_round_up(tile_b, 256), _round_up(pl.cdiv(B, 2), 256))
        num_tiles = pl.cdiv(B, tile_b)

    def full_const(a):
        return pl.BlockSpec(a.shape, lambda i: (0,) * a.ndim)

    # --- advisory cost estimate ----------------------------------------------
    flops = 2 * B * (obs_dim + goal_dim) * params[2].shape[1]
    for j in range(num_hidden - 1):
        w = params[3 + 2 * j]
        flops += 2 * B * w.shape[0] * w.shape[1]
    flops += 2 * B * params[-2].shape[1]
    bytes_accessed = int(
        obs.size * jnp.dtype(obs.dtype).itemsize
        + goal.size * jnp.dtype(goal.dtype).itemsize
        + B * 4
        + sum(p.size * jnp.dtype(p.dtype).itemsize for p in params))

    out = pl.pallas_call(
        _make_mlp_v_kernel(num_hidden),
        out_shape=jax.ShapeDtypeStruct((1, B), jnp.float32),
        grid=(num_tiles,),
        in_specs=[
            pl.BlockSpec((tile_b, obs_dim), lambda i: (i, 0)),
            pl.BlockSpec((tile_b, goal_dim), lambda i: (i, 0)),
        ] + [full_const(p) for p in params],
        out_specs=pl.BlockSpec((1, tile_b), lambda i: (0, i)),
        compiler_params=pltpu.CompilerParams(
            dimension_semantics=("parallel",),
            vmem_limit_bytes=48 * 1024 * 1024),
        cost_estimate=pl.CostEstimate(
            flops=flops, transcendentals=0, bytes_accessed=bytes_accessed),
    )(obs, goal, *params)

    # (1, B) -> (B,)  (equivalent of torch.squeeze(v, -1)).
    return out[0]


def init_params(key, obs_dim, goal_dim, hidden_sizes, dtype=jnp.float32):
    """Deterministic init mimicking nn.Linear default (U[-1/sqrt(fan_in), +])."""
    sizes = [obs_dim + goal_dim] + list(hidden_sizes) + [1]
    raw = []
    for j in range(len(sizes) - 1):
        fan_in, fan_out = sizes[j], sizes[j + 1]
        key, kw, kb = jax.random.split(key, 3)
        bound = 1.0 / math.sqrt(fan_in)
        w = jax.random.uniform(kw, (fan_in, fan_out), jnp.float32, -bound, bound)
        b = jax.random.uniform(kb, (1, fan_out), jnp.float32, -bound, bound)
        raw += [w, b]
    w1, b1 = raw[0], raw[1]
    params = [w1[:obs_dim], w1[obs_dim:], b1]
    for j in range(1, len(sizes) - 2):
        params += [raw[2 * j], raw[2 * j + 1]]
    params += [raw[-2].T, raw[-1]]  # last weight as (1, H_last) row, bias (1, 1)
    return tuple(p.astype(dtype) for p in params)


def reference_forward(obs, goal, params):
    num_hidden = (len(params) - 3) // 2
    f32 = lambda p: p.astype(jnp.float32)
    x = jnp.concatenate([obs, goal], axis=-1)
    w1 = jnp.concatenate([f32(params[0]), f32(params[1])], axis=0)
    h = jnp.maximum(x @ w1 + f32(params[2]), 0.0)
    idx = 3
    for _ in range(num_hidden - 1):
        h = jnp.maximum(h @ f32(params[idx]) + f32(params[idx + 1]), 0.0)
        idx += 2
    v = h @ f32(params[idx]).T + f32(params[idx + 1])
    return jnp.squeeze(v, axis=-1)


if __name__ == "__main__":
    key = jax.random.PRNGKey(0)
    batch, obs_dim, goal_dim = 8, 12, 4
    hidden_sizes = (32, 32)

    k_obs, k_goal, k_params, k_big = jax.random.split(key, 4)
    obs = jax.random.normal(k_obs, (batch, obs_dim), jnp.float32)
    goal = jax.random.normal(k_goal, (batch, goal_dim), jnp.float32)
    params = init_params(k_params, obs_dim, goal_dim, hidden_sizes)

    # Small-batch run (single exact tile).
    v = mlp_v_function(obs, goal, params)
    jax.block_until_ready(v)
    v_ref = reference_forward(obs, goal, params)
    assert v.shape == (batch,), v.shape
    assert jnp.allclose(v, v_ref, atol=1e-5, rtol=1e-5), "small-batch mismatch"

    # Multi-tile 'parallel' grid with a partial final tile (masked lane-dense store).
    B2 = 1000
    obs2 = jax.random.normal(k_big, (B2, obs_dim), jnp.float32)
    goal2 = jax.random.normal(jax.random.fold_in(k_big, 1), (B2, goal_dim),
                              jnp.float32)
    v2 = mlp_v_function(obs2, goal2, params, tile_b=256)
    jax.block_until_ready(v2)
    v2_ref = reference_forward(obs2, goal2, params)
    assert v2.shape == (B2,), v2.shape
    assert jnp.allclose(v2, v2_ref, atol=1e-5, rtol=1e-5), "multi-tile mismatch"

    # Default big-tile path + bf16 params (f32 accumulation inside the kernel).
    params_bf16 = jax.tree_util.tree_map(
        lambda p: p.astype(jnp.bfloat16), params)
    v3 = mlp_v_function(obs2, goal2, params_bf16)
    jax.block_until_ready(v3)
    assert v3.shape == (B2,), v3.shape
    assert jnp.allclose(v3, v2_ref, atol=5e-2, rtol=5e-2), "bf16 mismatch"

    print("KERNEL_OK")
</pallas_src>

<mosaic_0001>
module attributes {stable_mosaic.version = 11 : i64} {
  func.func @kernel(%arg0: i32, %arg1: memref<8x12xf32, #tpu.memory_space<vmem>>, %arg2: memref<8x4xf32, #tpu.memory_space<vmem>>, %arg3: memref<12x32xf32, #tpu.memory_space<vmem>>, %arg4: memref<4x32xf32, #tpu.memory_space<vmem>>, %arg5: memref<1x32xf32, #tpu.memory_space<vmem>>, %arg6: memref<32x32xf32, #tpu.memory_space<vmem>>, %arg7: memref<1x32xf32, #tpu.memory_space<vmem>>, %arg8: memref<1x32xf32, #tpu.memory_space<vmem>>, %arg9: memref<1x1xf32, #tpu.memory_space<vmem>>, %arg10: memref<1x8xf32, #tpu.memory_space<vmem>>) attributes {dimension_semantics = [#tpu.dimension_semantics<parallel>], iteration_bounds = array<i64: 1>, scalar_prefetch = 0 : i64, scratch_operands = 0 : i64, tpu.core_type = #tpu.core_type<tc>, window_params = [{transform_indices = @transform_0, window_bounds = array<i64: 8, 12>}, {transform_indices = @transform_1, window_bounds = array<i64: 8, 4>}, {pipeline_mode = #tpu.pipeline_mode<synchronous>, transform_indices = @transform_2, window_bounds = array<i64: 12, 32>}, {pipeline_mode = #tpu.pipeline_mode<synchronous>, transform_indices = @transform_3, window_bounds = array<i64: 4, 32>}, {pipeline_mode = #tpu.pipeline_mode<synchronous>, transform_indices = @transform_4, window_bounds = array<i64: 1, 32>}, {pipeline_mode = #tpu.pipeline_mode<synchronous>, transform_indices = @transform_5, window_bounds = array<i64: 32, 32>}, {pipeline_mode = #tpu.pipeline_mode<synchronous>, transform_indices = @transform_6, window_bounds = array<i64: 1, 32>}, {pipeline_mode = #tpu.pipeline_mode<synchronous>, transform_indices = @transform_7, window_bounds = array<i64: 1, 32>}, {pipeline_mode = #tpu.pipeline_mode<synchronous>, transform_indices = @transform_8, window_bounds = array<i64: 1, 1>}, {transform_indices = @transform_9, window_bounds = array<i64: 1, 8>}]} {
    %c0 = arith.constant 0 : index
    %c0_0 = arith.constant 0 : index
    %0 = vector.load %arg1[%c0, %c0_0] : memref<8x12xf32, #tpu.memory_space<vmem>>, vector<8x12xf32>
    %c0_1 = arith.constant 0 : index
    %c0_2 = arith.constant 0 : index
    %1 = vector.load %arg3[%c0_1, %c0_2] : memref<12x32xf32, #tpu.memory_space<vmem>>, vector<12x32xf32>
    %cst = arith.constant dense<0.000000e+00> : vector<8x32xf32>
    %2 = tpu.matmul %0, %1, %cst {dimension_numbers = #tpu.dot_dimension_numbers<[1], [0], [0], [1], [0, 0, 1, 1], [], []>} : vector<8x12xf32>, vector<12x32xf32>, vector<8x32xf32> -> vector<8x32xf32>
    %c0_3 = arith.constant 0 : index
    %c0_4 = arith.constant 0 : index
    %3 = vector.load %arg2[%c0_3, %c0_4] : memref<8x4xf32, #tpu.memory_space<vmem>>, vector<8x4xf32>
    %c0_5 = arith.constant 0 : index
    %c0_6 = arith.constant 0 : index
    %4 = vector.load %arg4[%c0_5, %c0_6] : memref<4x32xf32, #tpu.memory_space<vmem>>, vector<4x32xf32>
    %cst_7 = arith.constant dense<0.000000e+00> : vector<8x32xf32>
    %5 = tpu.matmul %3, %4, %cst_7 {dimension_numbers = #tpu.dot_dimension_numbers<[1], [0], [0], [1], [0, 0, 1, 1], [], []>} : vector<8x4xf32>, vector<4x32xf32>, vector<8x32xf32> -> vector<8x32xf32>
    %6 = arith.addf %2, %5 : vector<8x32xf32>
    %c0_8 = arith.constant 0 : index
    %c0_9 = arith.constant 0 : index
    %7 = vector.load %arg5[%c0_8, %c0_9] : memref<1x32xf32, #tpu.memory_space<vmem>>, vector<1x32xf32>
    %8 = vector.broadcast %7 : vector<1x32xf32> to vector<8x32xf32>
    %9 = arith.addf %6, %8 : vector<8x32xf32>
    %cst_10 = arith.constant 0.000000e+00 : f32
    %10 = vector.broadcast %cst_10 : f32 to vector<8x32xf32>
    %11 = arith.maximumf %9, %10 : vector<8x32xf32>
    %c0_11 = arith.constant 0 : index
    %c0_12 = arith.constant 0 : index
    %12 = vector.load %arg6[%c0_11, %c0_12] : memref<32x32xf32, #tpu.memory_space<vmem>>, vector<32x32xf32>
    %cst_13 = arith.constant dense<0.000000e+00> : vector<8x32xf32>
    %13 = tpu.matmul %11, %12, %cst_13 {dimension_numbers = #tpu.dot_dimension_numbers<[1], [0], [0], [1], [0, 0, 1, 1], [], []>} : vector<8x32xf32>, vector<32x32xf32>, vector<8x32xf32> -> vector<8x32xf32>
    %c0_14 = arith.constant 0 : index
    %c0_15 = arith.constant 0 : index
    %14 = vector.load %arg7[%c0_14, %c0_15] : memref<1x32xf32, #tpu.memory_space<vmem>>, vector<1x32xf32>
    %15 = vector.broadcast %14 : vector<1x32xf32> to vector<8x32xf32>
    %16 = arith.addf %13, %15 : vector<8x32xf32>
    %cst_16 = arith.constant 0.000000e+00 : f32
    %17 = vector.broadcast %cst_16 : f32 to vector<8x32xf32>
    %18 = arith.maximumf %16, %17 : vector<8x32xf32>
    %c0_17 = arith.constant 0 : index
    %c0_18 = arith.constant 0 : index
    %19 = vector.load %arg8[%c0_17, %c0_18] : memref<1x32xf32, #tpu.memory_space<vmem>>, vector<1x32xf32>
    %cst_19 = arith.constant dense<0.000000e+00> : vector<1x8xf32>
    %20 = tpu.matmul %19, %18, %cst_19 {dimension_numbers = #tpu.dot_dimension_numbers<[1], [1], [0], [0], [0, 0, 1, 0], [], []>} : vector<1x32xf32>, vector<8x32xf32>, vector<1x8xf32> -> vector<1x8xf32>
    %c0_20 = arith.constant 0 : index
    %c0_21 = arith.constant 0 : index
    %21 = vector.load %arg9[%c0_20, %c0_21] : memref<1x1xf32, #tpu.memory_space<vmem>>, vector<1x1xf32>
    %22 = vector.broadcast %21 : vector<1x1xf32> to vector<1x8xf32>
    %23 = arith.addf %20, %22 : vector<1x8xf32>
    %c0_22 = arith.constant 0 : index
    %c0_23 = arith.constant 0 : index
    %24 = vector.load %arg10[%c0_22, %c0_23] : memref<1x8xf32, #tpu.memory_space<vmem>>, vector<1x8xf32>
    tpu.vector_store %arg10[%c0_22, %c0_23], %23 {strides = array<i32>} : memref<1x8xf32, #tpu.memory_space<vmem>>, vector<1x8xf32>,
    return
  }
  func.func @transform_0(%arg0: i32) -> (i32, i32) {
    %c0_i32 = arith.constant 0 : i32
    %c0_i32_0 = arith.constant 0 : i32
    return %arg0, %c0_i32 : i32, i32
  }
  func.func @transform_1(%arg0: i32) -> (i32, i32) {
    %c0_i32 = arith.constant 0 : i32
    %c0_i32_0 = arith.constant 0 : i32
    return %arg0, %c0_i32 : i32, i32
  }
  func.func @transform_2(%arg0: i32) -> (i32, i32) {
    %c0_i32 = arith.constant 0 : i32
    %c0_i32_0 = arith.constant 0 : i32
    %c0_i32_1 = arith.constant 0 : i32
    return %c0_i32, %c0_i32_0 : i32, i32
  }
  func.func @transform_3(%arg0: i32) -> (i32, i32) {
    %c0_i32 = arith.constant 0 : i32
    %c0_i32_0 = arith.constant 0 : i32
    %c0_i32_1 = arith.constant 0 : i32
    return %c0_i32, %c0_i32_0 : i32, i32
  }
  func.func @transform_4(%arg0: i32) -> (i32, i32) {
    %c0_i32 = arith.constant 0 : i32
    %c0_i32_0 = arith.constant 0 : i32
    %c0_i32_1 = arith.constant 0 : i32
    return %c0_i32, %c0_i32_0 : i32, i32
  }
  func.func @transform_5(%arg0: i32) -> (i32, i32) {
    %c0_i32 = arith.constant 0 : i32
    %c0_i32_0 = arith.constant 0 : i32
    %c0_i32_1 = arith.constant 0 : i32
    return %c0_i32, %c0_i32_0 : i32, i32
  }
  func.func @transform_6(%arg0: i32) -> (i32, i32) {
    %c0_i32 = arith.constant 0 : i32
    %c0_i32_0 = arith.constant 0 : i32
    %c0_i32_1 = arith.constant 0 : i32
    return %c0_i32, %c0_i32_0 : i32, i32
  }
  func.func @transform_7(%arg0: i32) -> (i32, i32) {
    %c0_i32 = arith.constant 0 : i32
    %c0_i32_0 = arith.constant 0 : i32
    %c0_i32_1 = arith.constant 0 : i32
    return %c0_i32, %c0_i32_0 : i32, i32
  }
  func.func @transform_8(%arg0: i32) -> (i32, i32) {
    %c0_i32 = arith.constant 0 : i32
    %c0_i32_0 = arith.constant 0 : i32
    %c0_i32_1 = arith.constant 0 : i32
    return %c0_i32, %c0_i32_0 : i32, i32
  }
  func.func @transform_9(%arg0: i32) -> (i32, i32) {
    %c0_i32 = arith.constant 0 : i32
    %c0_i32_0 = arith.constant 0 : i32
    return %c0_i32, %arg0 : i32, i32
  }
}

</mosaic_0001>

<bundles_post_ra>
// kernel: tpu_custom_call.1
= control target key start
LH: loop header
LB: loop body
LE: loop exit
PB: predicated region body
PF: predicated region fallthrough
CT: control target
= control target key end

     0   :  { %s400_s0 = inlined_call_operand.vmem [shape: f32[8,12], index: 0, kind: input, shape index: {}]   ;;  %s401_s1 = inlined_call_operand.vmem [shape: f32[8,4], index: 1, kind: input, shape index: {}]   ;;  %s402_s2 = inlined_call_operand.hbm [shape: f32[12,32], index: 2, kind: input, shape index: {}]   ;;  %s403_s3 = inlined_call_operand.vmem [shape: f32[4,32], index: 3, kind: input, shape index: {}]   ;;  %s404_s4 = inlined_call_operand.vmem [shape: f32[1,32], index: 4, kind: input, shape index: {}]   ;;  %s405_s5 = inlined_call_operand.hbm [shape: f32[32,32], index: 5, kind: input, shape index: {}]   ;;  %s406_s6 = inlined_call_operand.vmem [shape: f32[1,32], index: 6, kind: input, shape index: {}]   ;;  %s407_s7 = inlined_call_operand.vmem [shape: f32[1,32], index: 7, kind: input, shape index: {}]   ;;  %s408_s8 = inlined_call_operand.<no memory space> [shape: f32[1,1], index: 8, kind: input, shape index: {}]   ;;  %s409_s9 = inlined_call_operand.hbm [shape: f32[1,8], index: 9, kind: output, shape index: {}]  }
   0x1   :  { %v14_v0 = vstv %s408_s8 }
   0x2   :  { %15 = vst [vmem:[#allocation2] sm:$0x1] %v14_v0 }
   0x3   :  { %16 = vsyncpa [#allocation4], 0 }
   0x4   :  { %17 = vsyncpa [#allocation7], 0 }
   0x5   :  { %18 = vsyncpa [#allocation5], 0  ;;  %s27_s13 = sshll.u32 %s402_s2, 4  ;;  %s314_s14 = smov [#allocation3]   ;;  %s28_s13 = int_to_ptr.hbm [resolvable:$true] %s27_s13 }
   0x6   :  { %s29_s15 = sshll.u32 %s314_s14, 4  ;;  %s44_s18 = sshll.u32 %s405_s5, 4  ;;  %s30_s15 = int_to_ptr.vmem [resolvable:$true] %s29_s15  ;;  %s45_s18 = int_to_ptr.hbm [resolvable:$true] %s44_s18 }
   0x7   :  { %s315_s19 = smov 128   ;;  %s316_s20 = smov 8  }
   0x8   :  { %35 = dma.hbm_to_vmem [thread:$0]  %s28_s13, 256, %s30_s15, [#allocation4], %s315_s19, %s315_s19, %s316_s20  }
   0x9   :  { %s317_s8 = smov [#allocation6]  }
   0xa   :  { %s46_s21 = sshll.u32 %s317_s8, 4  ;;  %s47_s21 = int_to_ptr.vmem [resolvable:$true] %s46_s21 }
   0xb   :  { %52 = dma.hbm_to_vmem [thread:$0]  %s45_s18, 512, %s47_s21, [#allocation7], %s315_s19, %s315_s19, %s316_s20  }
   0xc   :  { %308 = dma.done.wait [#allocation4], 256  }
   0xd   :  { %309 = vsyncadd [#allocation4], 4294967040 }
   0xe   :  { %310 = dma.done.wait [#allocation7], 512  }
   0xf   :  { %311 = vsyncadd [#allocation7], 4294966784  ;;  %vm76_vm0 = vcmask 1043456   ;;  %vm72_vm1 = vcmask 31744   ;;  %v69_v1 = vld [vmem:[#allocation3 + $0x8] sm:$0xf] }
  0x10   :  { %v71_v2 = vld [vmem:[%s403_s3] sm:$0xf]  ;;  %222 = vmatpush.msk.msra.mxu1 %vm76_vm0, %v69_v1  ;;  %vm100_vm2 = vcmask 97280   ;;  %v136_v6 = vld [vmem:[#allocation6 + $0x18] sm:$0xff]  ;;  %v133_v9 = vld [vmem:[#allocation6] sm:$0xff]  ;;  %vm141_vm3 = vcmask 261120  }
  0x11   :  { %v68_v3 = vld [vmem:[#allocation3] sm:$0xff]  ;;  %220 = vmatpush.msk.msra.mxu0 %vm76_vm0, %v71_v2  ;;  %157 = vmatpush.msra.mxu2 %v136_v6  ;;  %v134_v8 = vld [vmem:[#allocation6 + $0x8] sm:$0xff]  ;;  %v318_v17 = vmov 0   ;;  %s319_s28 = smov [#allocation8]   ;;  %s209_s11 = sshll.u32 %s409_s9, 4  ;;  %vm200_vm4 = vcmask 57344   ;;  %s210_s11 = int_to_ptr.hbm [resolvable:$true] %s209_s11 }
  0x12   :  { %v70_v4 = vld [vmem:[%s401_s1] sm:$0xff]  ;;  %122 = vmatpush.msra.mxu1 %v68_v3  ;;  %233 = vset.pattern.permute.xlu0 %v318_v17  ;;  %s207_s29 = sshll.u32 %s319_s28, 4  ;;  %s208_s29 = int_to_ptr.vmem [resolvable:$true] %s207_s29 }
  0x13   :  { %v67_v5 = vld [vmem:[%s400_s0] sm:$0xff]  ;;  %221 = vmatmul.msk.f32.vlgmr.msra.gmra.mxu0 %vm72_vm1, %v70_v4 }
  0x14   :  { %223 = vmatmul.msk.f32.vlgmr.msra.gmra.mxu1 %vm100_vm2, %v67_v5  ;;  %v135_v7 = vld [vmem:[#allocation6 + $0x10] sm:$0xff]  ;;  %v234_v11 = vld [vmem:[%s404_s4] ss:$0 sm:$0xff] }
  0x15   :  { %158 = vmatpush.msra.mxu2 %v135_v7  ;;  %v167_v16 = vld [vmem:[#allocation2] sm:$0x1] }
  0x16   :  { %170 = vperm.xlu0 %233, %v167_v16   ;;  %v235_v18 = vld [vmem:[%s406_s6] ss:$0 sm:$0xff] }
  0x17   :  { %159 = vmatpush.msra.mxu2 %v134_v8  ;;  %v166_v22 = vld [vmem:[%s407_s7] sm:$0x1] }
  0x19   :  { %160 = vmatpush.msra.mxu2 %v133_v9 }
  0x88   :  { %v171_v23 = vpop.permute.xlu0 %170 }
  0x89   :  { %v173_v24 = vperm.slane %v171_v23, 0 }
  0x90   :  { %v97_v10 = vpop.f32.mrf.mxu0 }
  0x91   :  { %v124_v12 = vpop.f32.mrf.mxu1 }
  0x92   :  { %v125_v13 = vadd.f32 %v124_v12, %v97_v10 }
  0x94   :  { %v131_v14 = vadd.f32 %v234_v11, %v125_v13 }
  0x96   :  { %v132_v15 = vmax.f32 %v131_v14, 0.0 }
  0x98   :  { %224 = vmatmul.msk.f32.vlgmr.msra.gmra.mxu2 %vm141_vm3, %v132_v15 }
 0x11b   :  { %v162_v19 = vpop.f32.mrf.mxu2 }
 0x11c   :  { %v163_v20 = vadd.f32 %v235_v18, %v162_v19 }
 0x11e   :  { %v165_v21 = vmax.f32 %v163_v20, 0.0 }
 0x120   :  { %225 = vmatpush.xpose.msk.msra.mxu3 %vm141_vm3, %v165_v21 }
 0x123   :  { %226 = vmatmul.msk.f32.vlgmr.msra.gmra.mxu3 %vm141_vm3, %v166_v22 }
 0x1a6   :  { %v197_v25 = vpop.f32.mrf.mxu3 }
 0x1a7   :  { %v198_v26 = vadd.f32 %v197_v25, %v173_v24 }
 0x1a9   :  { %201 = vst.msk [vmem:[#allocation8] sm:$0x1] %vm200_vm4, %v198_v26 }
 0x1aa   :  { %212 = dma.vmem_to_hbm [thread:$0]  %s208_s29, 16, %s210_s11, [#allocation5]  }
 0x1ab   :  { %312 = dma.done.wait [#allocation5], 16  }
 0x1ac   :  { %313 = vsyncadd [#allocation5], 4294967280 }
 0x1ad   :  { %217 = vsyncpa [#allocation4], 1 }
 0x1ae   :  { %218 = vsyncpa [#allocation7], 1 }
 0x1af   :  { %219 = vsyncpa [#allocation5], 1 }

</bundles_post_ra>
